<compile_context>
chip_gen: v6e
topology: v6e:2x2x1
jax: 0.10.0
libtpu: 0.0.40
codegen_flags: <defaults>
</compile_context>

<pallas_src>
import jax
import jax.numpy as jnp
from jax import lax
from jax.experimental import pallas as pl
from jax.experimental.pallas import tpu as pltpu

_LANES = 128
_TARGET_BLOCK_BYTES = 2 * 1024 * 1024  # per-array block; 4 arrays x 2 buffers ~= 16 MiB VMEM


def _xpos_kernel(x_ref, cos_ref, sin_ref, o_ref):
    # x_ref / cos_ref / sin_ref / o_ref: (TR, 128) tiles.
    x = x_ref[...].astype(jnp.float32)
    cos = cos_ref[...].astype(jnp.float32)
    sin = sin_ref[...].astype(jnp.float32)  # sign-baked: -sin on even lanes, +sin on odd lanes

    lane_axis = x.ndim - 1  # pltpu.roll requires a non-negative axis index
    L = x.shape[lane_axis]
    x_prev = pltpu.roll(x, shift=1, axis=lane_axis)      # x_prev[..., k] = x[..., k-1]
    x_next = pltpu.roll(x, shift=L - 1, axis=lane_axis)  # x_next[..., k] = x[..., k+1]

    lane = lax.broadcasted_iota(jnp.int32, x.shape, dimension=lane_axis)
    even = (lane & 1) == 0
    # rotate_every_two without its sign: even lane -> neighbour k+1, odd lane -> k-1.
    # Wrap-around lanes (lane 0 of x_prev, lane L-1 of x_next) fall on the unselected parity.
    rot = jnp.where(even, x_next, x_prev)

    o_ref[...] = (x * cos + rot * sin).astype(o_ref.dtype)


def _build_tables(length, head_dim, scale_base, offset=0, downscale=False):
    """Plain-JAX glue mirroring the PyTorch module (forward() convention), in float32."""
    f32 = jnp.float32
    half = head_dim // 2
    # buffer registered in __init__
    scale_buf = (jnp.arange(0, head_dim, 2, dtype=f32) + 0.4 * head_dim) / (1.4 * head_dim)

    max_pos = length + offset
    pos = jnp.arange(0, max_pos, dtype=f32)
    scale = scale_buf[None, :] ** (pos / scale_base)[:, None]          # (max_pos, half)

    inv_freq = 1.0 / (10000.0 ** (jnp.arange(0, half, dtype=f32) / half))
    sinusoid = pos[:, None] * inv_freq[None, :]                        # (max_pos, half)
    sin = jnp.sin(sinusoid)
    cos = jnp.cos(sinusoid)

    # keep only the last `length` positions (positions offset .. offset+length-1)
    scale = scale[-length:]
    sin = sin[-length:]
    cos = cos[-length:]
    if downscale:
        scale = 1.0 / scale

    # duplicate_interleave(t * scale): each half-dim element repeated twice along D
    sin_d = jnp.repeat(sin * scale, 2, axis=-1)                        # (length, head_dim) f32
    cos_d = jnp.repeat(cos * scale, 2, axis=-1)
    return cos_d, sin_d


# Cache of pre-flattened, sign-baked, padded tables keyed on the static config, so the
# per-call path runs only pad/reshape + the Pallas kernel.
_TABLE_CACHE = {}


def _get_tables(S, D, dtype, scale_base, offset, downscale):
    key = (S, D, jnp.dtype(dtype).name, scale_base, offset, downscale)
    hit = _TABLE_CACHE.get(key)
    if hit is not None:
        return hit

    cos_d, sin_d = _build_tables(S, D, scale_base, offset, downscale)  # (S, D) f32
    sign = jnp.where((jnp.arange(D) & 1) == 0, -1.0, 1.0).astype(jnp.float32)
    cos_f = cos_d.reshape(-1)
    sin_f = (sin_d * sign[None, :]).reshape(-1)

    N = S * D
    N_pad = ((N + _LANES - 1) // _LANES) * _LANES
    if N_pad != N:
        cos_f = jnp.pad(cos_f, (0, N_pad - N))
        sin_f = jnp.pad(sin_f, (0, N_pad - N))
    R = N_pad // _LANES
    cos_k = cos_f.reshape(R, _LANES).astype(dtype)
    sin_k = sin_f.reshape(R, _LANES).astype(dtype)

    _TABLE_CACHE[key] = (cos_k, sin_k)
    return cos_k, sin_k


def _choose_row_tile(R, B, itemsize):
    """Pick the row-tile size (rows of 128 lanes) for the (row_tiles, batch) grid."""
    # Byte-based target: ~2 MiB per array block (4096 rows f32, 8192 rows bf16).
    target_rows = max(8, _TARGET_BLOCK_BYTES // (_LANES * itemsize))
    n_tiles = max(1, -(-R // target_rows))
    # v7x megacore occupancy: with batch == 1 the parallel row axis needs >= 2 steps so
    # both TensorCores get work (no effect on v5e/v6e single-TC chips).
    if B == 1 and n_tiles < 2:
        n_tiles = 2
    tr = -(-R // n_tiles)            # even split: avoid a nearly-empty trailing block
    tr = ((tr + 7) // 8) * 8         # block rows must be a multiple of 8 (or the full dim)
    if tr >= R:
        return R
    return tr


@jax.jit
def _xpos_apply(x, cos_k, sin_k):
    B, S, D = x.shape
    R, L = cos_k.shape               # L == 128
    N = S * D
    N_pad = R * L

    # Lane-dense layout: flatten (S, D) into rows of 128 lanes (pad the flat tail if
    # needed) so every store is a full unmasked 128-lane store even for head_dim < 128.
    # Flat-index parity equals d parity (D even) and each row starts at an even flat
    # index, so the roll + parity trick in the kernel stays correct; padding is a whole
    # flat tail, so no rotary pair ever straddles into the pad.
    x_flat = x.reshape(B, N)
    if N_pad != N:
        x_flat = jnp.pad(x_flat, ((0, 0), (0, N_pad - N)))
    x_k = x_flat.reshape(B, R, L)

    TR = _choose_row_tile(R, B, jnp.dtype(x.dtype).itemsize)
    grid = (pl.cdiv(R, TR), B)       # row-tile outer, batch inner: cos/sin block index is
                                     # batch-invariant, so tables are DMA'd once per row-tile.

    out = pl.pallas_call(
        _xpos_kernel,
        out_shape=jax.ShapeDtypeStruct((B, R, L), x.dtype),
        grid_spec=pltpu.PrefetchScalarGridSpec(
            num_scalar_prefetch=0,
            grid=grid,
            in_specs=[
                pl.BlockSpec((None, TR, L), lambda r, b: (b, r, 0)),   # x (batch squeezed)
                pl.BlockSpec((TR, L), lambda r, b: (r, 0)),            # cos (batch-invariant)
                pl.BlockSpec((TR, L), lambda r, b: (r, 0)),            # signed sin
            ],
            out_specs=pl.BlockSpec((None, TR, L), lambda r, b: (b, r, 0)),
        ),
        compiler_params=pltpu.CompilerParams(
            dimension_semantics=("parallel", "parallel"),
            vmem_limit_bytes=32 * 1024 * 1024,
        ),
    )(x_k, cos_k, sin_k)

    out_flat = out.reshape(B, N_pad)
    if N_pad != N:
        out_flat = out_flat[:, :N]
    return out_flat.reshape(B, S, D)


def xpos_forward(x, scale_base=512, offset=0, downscale=False):
    B, S, D = x.shape
    if D % 2 != 0:
        raise ValueError("head_dim must be even for XPOS")
    cos_k, sin_k = _get_tables(S, D, x.dtype, scale_base, offset, downscale)
    return _xpos_apply(x, cos_k, sin_k)


def _xpos_reference(x, scale_base=512, offset=0, downscale=False):
    """Pure-JAX reference mirroring the PyTorch module (stack/reshape formulation)."""
    B, S, D = x.shape
    cos_d, sin_d = _build_tables(S, D, scale_base, offset, downscale)
    xf = x.astype(jnp.float32)
    x1 = xf[..., 0::2]
    x2 = xf[..., 1::2]
    rot = jnp.stack([-x2, x1], axis=-1).reshape(xf.shape)
    return xf * cos_d[None, :, :D] + rot * sin_d[None, :, :D]


if __name__ == "__main__":
    key = jax.random.PRNGKey(0)
    k1, k2, k3 = jax.random.split(key, 3)

    # 1) Lane-dense path, no padding: batch=2, seq=8, head_dim=32 (S*D = 256).
    B, S, D = 2, 8, 32
    x = jax.random.normal(k1, (B, S, D), dtype=jnp.float32)
    out = jax.block_until_ready(xpos_forward(x, scale_base=512))
    ref = _xpos_reference(x, scale_base=512)
    assert out.shape == (B, S, D)
    assert jnp.allclose(out.astype(jnp.float32), ref, atol=1e-5, rtol=1e-5), \
        "mismatch vs reference"

    # 2) Padded path (S*D = 448, not a multiple of 128) + offset/downscale.
    B2, S2, D2 = 2, 7, 64
    x2 = jax.random.normal(k2, (B2, S2, D2), dtype=jnp.float32)
    out2 = jax.block_until_ready(xpos_forward(x2, scale_base=512, offset=3, downscale=True))
    ref2 = _xpos_reference(x2, scale_base=512, offset=3, downscale=True)
    assert jnp.allclose(out2.astype(jnp.float32), ref2, atol=1e-5, rtol=1e-5), \
        "mismatch vs reference (padded path)"

    # 3) bf16 input with batch == 1 (exercises the megacore row split): seq=16, head_dim=128.
    B3, S3, D3 = 1, 16, 128
    x3 = jax.random.normal(k3, (B3, S3, D3), dtype=jnp.float32).astype(jnp.bfloat16)
    out3 = jax.block_until_ready(xpos_forward(x3, scale_base=512))
    ref3 = _xpos_reference(x3, scale_base=512)
    assert jnp.allclose(out3.astype(jnp.float32), ref3, atol=3e-2, rtol=3e-2), \
        "mismatch vs reference (bf16 path)"

    print("KERNEL_OK")
</pallas_src>

<mosaic_0001>
module attributes {stable_mosaic.version = 11 : i64} {
  func.func @_xpos_kernel(%arg0: i32, %arg1: i32, %arg2: memref<1x2x128xf32, #tpu.memory_space<vmem>>, %arg3: memref<2x128xf32, #tpu.memory_space<vmem>>, %arg4: memref<2x128xf32, #tpu.memory_space<vmem>>, %arg5: memref<1x2x128xf32, #tpu.memory_space<vmem>>) attributes {dimension_semantics = [#tpu.dimension_semantics<parallel>, #tpu.dimension_semantics<parallel>], iteration_bounds = array<i64: 1, 2>, scalar_prefetch = 0 : i64, scratch_operands = 0 : i64, tpu.core_type = #tpu.core_type<tc>, window_params = [{transform_indices = @transform_0, window_bounds = array<i64: 1, 2, 128>}, {transform_indices = @transform_1, window_bounds = array<i64: 2, 128>}, {transform_indices = @transform_2, window_bounds = array<i64: 2, 128>}, {transform_indices = @transform_3, window_bounds = array<i64: 1, 2, 128>}]} {
    %c0 = arith.constant 0 : index
    %c0_0 = arith.constant 0 : index
    %c0_1 = arith.constant 0 : index
    %0 = vector.load %arg2[%c0, %c0_0, %c0_1] : memref<1x2x128xf32, #tpu.memory_space<vmem>>, vector<1x2x128xf32>
    %1 = vector.shape_cast %0 : vector<1x2x128xf32> to vector<2x128xf32>
    %c0_2 = arith.constant 0 : index
    %c0_3 = arith.constant 0 : index
    %2 = vector.load %arg3[%c0_2, %c0_3] : memref<2x128xf32, #tpu.memory_space<vmem>>, vector<2x128xf32>
    %c0_4 = arith.constant 0 : index
    %c0_5 = arith.constant 0 : index
    %3 = vector.load %arg4[%c0_4, %c0_5] : memref<2x128xf32, #tpu.memory_space<vmem>>, vector<2x128xf32>
    %c1_i32 = arith.constant 1 : i32
    %4 = tpu.dynamic_rotate %1 by %c1_i32 dim 1 : vector<2x128xf32>, i32 -> vector<2x128xf32>
    %c127_i32 = arith.constant 127 : i32
    %5 = tpu.dynamic_rotate %1 by %c127_i32 dim 1 : vector<2x128xf32>, i32 -> vector<2x128xf32>
    %6 = tpu.iota {dimensions = array<i32: 1>} : vector<2x128xi32>
    %c1_i32_6 = arith.constant 1 : i32
    %7 = vector.broadcast %c1_i32_6 : i32 to vector<2x128xi32>
    %8 = arith.andi %6, %7 : vector<2x128xi32>
    %c0_i32 = arith.constant 0 : i32
    %9 = vector.broadcast %c0_i32 : i32 to vector<2x128xi32>
    %10 = arith.cmpi eq, %8, %9 : vector<2x128xi32>
    %11 = arith.select %10, %5, %4 : vector<2x128xi1>, vector<2x128xf32>
    %12 = arith.mulf %1, %2 : vector<2x128xf32>
    %13 = arith.mulf %11, %3 : vector<2x128xf32>
    %14 = arith.addf %12, %13 : vector<2x128xf32>
    %c0_7 = arith.constant 0 : index
    %c0_8 = arith.constant 0 : index
    %c0_9 = arith.constant 0 : index
    %15 = vector.load %arg5[%c0_7, %c0_8, %c0_9] : memref<1x2x128xf32, #tpu.memory_space<vmem>>, vector<1x2x128xf32>
    %16 = vector.shape_cast %15 : vector<1x2x128xf32> to vector<2x128xf32>
    %17 = vector.shape_cast %14 : vector<2x128xf32> to vector<1x2x128xf32>
    tpu.vector_store %arg5[%c0_7, %c0_8, %c0_9], %17 {strides = array<i32>} : memref<1x2x128xf32, #tpu.memory_space<vmem>>, vector<1x2x128xf32>,
    return
  }
  func.func @transform_0(%arg0: i32, %arg1: i32) -> (i32, i32, i32) {
    %c0_i32 = arith.constant 0 : i32
    %c0_i32_0 = arith.constant 0 : i32
    return %arg1, %arg0, %c0_i32 : i32, i32, i32
  }
  func.func @transform_1(%arg0: i32, %arg1: i32) -> (i32, i32) {
    %c0_i32 = arith.constant 0 : i32
    %c0_i32_0 = arith.constant 0 : i32
    return %arg0, %c0_i32 : i32, i32
  }
  func.func @transform_2(%arg0: i32, %arg1: i32) -> (i32, i32) {
    %c0_i32 = arith.constant 0 : i32
    %c0_i32_0 = arith.constant 0 : i32
    return %arg0, %c0_i32 : i32, i32
  }
  func.func @transform_3(%arg0: i32, %arg1: i32) -> (i32, i32, i32) {
    %c0_i32 = arith.constant 0 : i32
    %c0_i32_0 = arith.constant 0 : i32
    return %arg1, %arg0, %c0_i32 : i32, i32, i32
  }
}

</mosaic_0001>

<bundles_post_ra>
// kernel: _xpos_apply.1
= control target key start
LH: loop header
LB: loop body
LE: loop exit
PB: predicated region body
PF: predicated region fallthrough
CT: control target
= control target key end

     0   :  { %s435_s12 = smov 0   ;;  %s437_s13 = smov 0   ;;  %s474_s0 = inlined_call_operand.vmem [shape: f32[2,2,128], index: 0, kind: input, shape index: {}]   ;;  %s475_s1 = inlined_call_operand.vmem [shape: f32[2,128], index: 1, kind: input, shape index: {}]   ;;  %s476_s2 = inlined_call_operand.vmem [shape: f32[2,128], index: 2, kind: input, shape index: {}]   ;;  %s477_s3 = inlined_call_operand.vmem [shape: f32[2,2,128], index: 3, kind: output, shape index: {}]  }
   0x1   :  { %s439_s14 = smov 0  }
   0x2 LB: > { %s22_s15 = sadd.s32 1, %s407_s13  ;;  %p358_p0 = scmp.ge.s32.totalorder %s411_s14, 1  ;;  %s411_s14 = sphi %s439_s14, %s13_s14   ;;  %s407_s13 = sphi %s437_s13, %s479_s13   ;;  %s403_s12 = sphi %s435_s12, %s478_s12  }
   0x3   : > { %p23_p1 = scmp.ge.s32.totalorder %s22_s15, 2  ;;  %p173_p2 = scmp.lt.s32.totalorder %s411_s14, 3 }
   0x5   : > { %s481_s15 = smov (%p23_p1, %s22_s15), 0  ;;  %p174_p3 = pnand %p358_p0, %p173_p2 }
   0x6   : > { %p209_p4 = scmp.lt.s32.totalorder (!%p174_p3), %s403_s12, 1  ;;  %s413_s20 = smov (!%p174_p3), 1  }
   0x7   : > { %177 = sbr.rel (%p174_p3) target bundleno = 141 (0x8d), region = 32  ;;  %s414_s21 = smov (!%p174_p3), 127  }
   0xc   : > { %s483_s12 = smov (!%p209_p4, %s403_s12), 1  ;;  %v238_v1 = vlaneseq  ;;  %v232_v5 = vld [vmem:[%s475_s1] sm:$0x3] }
   0xd   : > { %s359_s16 = sshll.u32 %s483_s12, 1  ;;  %v233_v6 = vld [vmem:[%s476_s2] sm:$0x3] }
   0xe   : > { %s215_s19 = scalar_lea.vmem %s474_s0, %s359_s16  ;;  %v239_v2 = vand.u32 127, %v238_v1  ;;  %s230_s28 = scalar_lea.vmem %s477_s3, %s359_s16 }
   0xf   : > { %v231_v0 = vld [vmem:[%s215_s19] sm:$0x3] }
  0x10   : > { %234 = vrot.lane.b32.xlu0 %v231_v0, %s413_s20  ;;  %v240_v3 = vand.u32 1, %v239_v2  ;;  %v243_v7 = vmul.f32 %v232_v5, %v231_v0 }
  0x12   : > { %vm241_vm0 = vcmp.eq.s32.totalorder %v240_v3, 0 }
  0x14   : > { %236 = vrot.lane.b32.xlu0 %v231_v0, %s414_s21 }
  0x82   : > { %v235_v4 = vpop.permute.xlu0 %234 }
  0x86   : > { %v237_v8 = vpop.permute.xlu0 %236 }
  0x87   : > { %v242_v9 = vsel %vm241_vm0, %v237_v8, %v235_v4 }
  0x88   : > { %v244_v10 = vmul.f32 %v242_v9, %v233_v6 }
  0x8a   : > { %v245_v11 = vadd.f32 %v244_v10, %v243_v7 }
  0x8c   : > { %246 = vst [vmem:[%s230_s28] sm:$0x3] %v245_v11 }
  0x8d PF: > { %s13_s14 = sadd.s32 1, %s411_s14   ;;  %s478_s12 = smov %s407_s13 }
  0x8e   : > { %p10_p5 = scmp.ge.s32.totalorder %s13_s14, 4   ;;  %s479_s13 = smov %s481_s15 }
  0x90   :  { %12 = sbr.rel (!%p10_p5) target bundleno = 2 (0x2), region = 68 }

</bundles_post_ra>
